<compile_context>
chip_gen: v5e
topology: v5e:2x2
jax: 0.10.0
libtpu: 0.0.40
codegen_flags: <defaults>
</compile_context>

<pallas_src>
import functools

import jax
import jax.numpy as jnp
from jax.experimental import pallas as pl
from jax.experimental.pallas import tpu as pltpu

_LANES = 128


def _rebin_matrix(old_edges: jnp.ndarray, new_edges: jnp.ndarray) -> jnp.ndarray:
    """M[i, j] = overlap(old bin i, new bin j) / width(old bin i).

    Equivalent to the per-new-bin loop in the PyTorch `_rebin_pc`: p_new = probs @ M.
    Zero-overlap pairs contribute exactly 0, matching the strict inequality mask in the
    reference (touching edges give exactly 0 overlap).
    """
    old_l = old_edges[:-1][:, None]   # (K_old, 1)
    old_r = old_edges[1:][:, None]    # (K_old, 1)
    new_l = new_edges[:-1][None, :]   # (1, K_new)
    new_r = new_edges[1:][None, :]    # (1, K_new)
    overlap = jnp.clip(jnp.minimum(old_r, new_r) - jnp.maximum(old_l, new_l), 0.0, None)
    width = old_r - old_l             # (K_old, 1)
    return (overlap / width).astype(jnp.float32)   # (K_old, K_new)


def _round_up(x: int, m: int) -> int:
    return ((x + m - 1) // m) * m


def rebin_adapter_kernel(x_ref, w_ref, b_ref, m_ref, o_ref):
    # Linear "model": logits = x @ W + b   (MXU, bf16 inputs, f32 accumulation)
    logits = jnp.dot(x_ref[...], w_ref[...], preferred_element_type=jnp.float32)
    logits = logits + b_ref[...]          # padded bins carry bias=-1e30 -> exp() == 0
    # Softmax over the (padded, lane-dense) old-bin axis.
    mx = jnp.max(logits, axis=-1, keepdims=True)
    e = jnp.exp(logits - mx)
    denom = jnp.sum(e, axis=-1, keepdims=True)
    probs = e * pl.reciprocal(denom, approx=True)   # EUP vrcp — effectively free
    # Rebin onto the common grid: probs @ M   (MXU, bf16 inputs, f32 accumulation)
    rebinned = jnp.dot(probs.astype(jnp.bfloat16), m_ref[...],
                       preferred_element_type=jnp.float32)
    eps = jnp.finfo(jnp.float32).tiny
    o_ref[...] = jnp.log(rebinned + eps).astype(o_ref.dtype)


@functools.partial(jax.jit, static_argnames=("block_b",))
def rebin_adapter_forward(x, w, b, rebin_m, *, block_b: int = 1024):
    B, D = x.shape
    k_old = w.shape[1]
    k_new = rebin_m.shape[1]

    # --- lane-dense padding of the bin axes (pure parameter plumbing, done once) ---
    k_old_p = _round_up(max(k_old, _LANES), _LANES)
    k_new_p = _round_up(max(k_new, _LANES), _LANES)
    w_p = jnp.pad(w, ((0, 0), (0, k_old_p - k_old))).astype(jnp.bfloat16)
    # padded logits get a huge negative bias -> softmax mass on padded bins is exactly 0
    b_p = jnp.pad(b.astype(jnp.float32), ((0, 0), (0, k_old_p - k_old)),
                  constant_values=-1e30)
    m_p = jnp.pad(rebin_m, ((0, k_old_p - k_old), (0, k_new_p - k_new))).astype(jnp.bfloat16)
    x_bf = x.astype(jnp.bfloat16)

    # --- batch tiling: big VMEM-sized tiles, multiple of 8 sublanes ---
    tb = min(block_b, B)
    if tb < B:
        tb = max(8, (tb // 8) * 8)
    # keep double-buffered x/out tiles well under the scoped-VMEM budget (v7x = 64 MiB phys)
    bytes_per_row = 2 * (D * 2) + 2 * (k_new_p * 4)        # 2x buffers: x bf16 + out f32
    max_tb = max(8, (int((20 * 1024 * 1024) // bytes_per_row) // 8) * 8)
    tb = min(tb, max_tb) if tb < B else tb

    b_padded = _round_up(B, tb)
    if b_padded != B:
        x_bf = jnp.pad(x_bf, ((0, b_padded - B), (0, 0)))
    grid = (b_padded // tb,)

    # advisory cost hint for XLA scheduling around the custom call
    cost = pl.CostEstimate(
        flops=2 * b_padded * D * k_old_p + 2 * b_padded * k_old_p * k_new_p,
        transcendentals=b_padded * (k_old_p + k_new_p),
        bytes_accessed=(x_bf.size * 2 + w_p.size * 2 + b_p.size * 4 + m_p.size * 2
                        + b_padded * k_new_p * 4),
    )

    # explicit VMEM limit: resident params (2x buffers) + pipelined tiles, with headroom
    param_bytes = 2 * (w_p.size * 2 + b_p.size * 4 + m_p.size * 2)
    tile_bytes = 2 * (tb * D * 2 + tb * k_new_p * 4)
    vmem_limit = int(min(64 * 1024 * 1024,
                         max(32 * 1024 * 1024, 2 * (param_bytes + tile_bytes))))

    out_padded = pl.pallas_call(
        rebin_adapter_kernel,
        out_shape=jax.ShapeDtypeStruct((b_padded, k_new_p), jnp.float32),
        grid_spec=pl.GridSpec(
            grid=grid,
            in_specs=[
                pl.BlockSpec((tb, D), lambda i: (i, 0)),            # x tile, pipelined
                pl.BlockSpec((D, k_old_p), lambda i: (0, 0)),       # W, VMEM-resident
                pl.BlockSpec((1, k_old_p), lambda i: (0, 0)),       # bias, VMEM-resident
                pl.BlockSpec((k_old_p, k_new_p), lambda i: (0, 0)),  # rebin M, VMEM-resident
            ],
            out_specs=pl.BlockSpec((tb, k_new_p), lambda i: (i, 0)),
        ),
        compiler_params=pltpu.CompilerParams(
            dimension_semantics=("parallel",),
            vmem_limit_bytes=vmem_limit,
        ),
        cost_estimate=cost,
    )(x_bf, w_p, b_p, m_p)

    return out_padded[:B, :k_new]


def reference_forward(x, w, b, old_edges, new_edges):
    logits = x @ w + b
    probs = jax.nn.softmax(logits, axis=-1)
    m = _rebin_matrix(old_edges, new_edges)
    rebinned = probs @ m
    return jnp.log(rebinned + jnp.finfo(jnp.float32).tiny)


if __name__ == "__main__":
    key = jax.random.PRNGKey(0)
    kx, kw, kb = jax.random.split(key, 3)

    B, D = 8, 32           # batch, input features
    K_OLD, K_NEW = 16, 12  # model's bin count, common-grid bin count

    # Deterministic inputs / parameters
    x = jax.random.normal(kx, (B, D), dtype=jnp.float32)
    w = jax.random.normal(kw, (D, K_OLD), dtype=jnp.float32) * 0.1
    b = jax.random.normal(kb, (1, K_OLD), dtype=jnp.float32) * 0.01

    # Binning edges: the model's own grid vs. the common grid (edges_star)
    old_edges = jnp.linspace(0.0, 1.0, K_OLD + 1, dtype=jnp.float32)
    edges_star = jnp.linspace(-0.1, 1.1, K_NEW + 1, dtype=jnp.float32)

    rebin_m = _rebin_matrix(old_edges, edges_star)  # (K_OLD, K_NEW), plain-JAX param setup

    out = rebin_adapter_forward(x, w, b, rebin_m)
    out = jax.block_until_ready(out)

    ref = reference_forward(x, w, b, old_edges, edges_star)
    assert out.shape == (B, K_NEW)
    # bf16 MXU feeds + approx reciprocal -> relative error ~1e-3; zero-overlap bins
    # (exact log(tiny)) match exactly in both paths.
    assert jnp.allclose(out, ref, atol=2e-2, rtol=2e-2), "mismatch vs. reference"

    print("KERNEL_OK")
</pallas_src>

<mosaic_0001>
module attributes {stable_mosaic.version = 11 : i64} {
  func.func @rebin_adapter_kernel(%arg0: i32, %arg1: memref<8x32xbf16, #tpu.memory_space<vmem>>, %arg2: memref<32x128xbf16, #tpu.memory_space<vmem>>, %arg3: memref<1x128xf32, #tpu.memory_space<vmem>>, %arg4: memref<128x128xbf16, #tpu.memory_space<vmem>>, %arg5: memref<8x128xf32, #tpu.memory_space<vmem>>) attributes {dimension_semantics = [#tpu.dimension_semantics<parallel>], iteration_bounds = array<i64: 1>, scalar_prefetch = 0 : i64, scratch_operands = 0 : i64, tpu.core_type = #tpu.core_type<tc>, window_params = [{transform_indices = @transform_0, window_bounds = array<i64: 8, 32>}, {pipeline_mode = #tpu.pipeline_mode<synchronous>, transform_indices = @transform_1, window_bounds = array<i64: 32, 128>}, {pipeline_mode = #tpu.pipeline_mode<synchronous>, transform_indices = @transform_2, window_bounds = array<i64: 1, 128>}, {pipeline_mode = #tpu.pipeline_mode<synchronous>, transform_indices = @transform_3, window_bounds = array<i64: 128, 128>}, {transform_indices = @transform_4, window_bounds = array<i64: 8, 128>}]} {
    %c0 = arith.constant 0 : index
    %c0_0 = arith.constant 0 : index
    %0 = vector.load %arg1[%c0, %c0_0] : memref<8x32xbf16, #tpu.memory_space<vmem>>, vector<8x32xbf16>
    %c0_1 = arith.constant 0 : index
    %c0_2 = arith.constant 0 : index
    %1 = vector.load %arg2[%c0_1, %c0_2] : memref<32x128xbf16, #tpu.memory_space<vmem>>, vector<32x128xbf16>
    %cst = arith.constant dense<0.000000e+00> : vector<8x128xf32>
    %2 = tpu.matmul %0, %1, %cst {dimension_numbers = #tpu.dot_dimension_numbers<[1], [0], [0], [1], [0, 0, 1, 1], [], []>} : vector<8x32xbf16>, vector<32x128xbf16>, vector<8x128xf32> -> vector<8x128xf32>
    %c0_3 = arith.constant 0 : index
    %c0_4 = arith.constant 0 : index
    %3 = vector.load %arg3[%c0_3, %c0_4] : memref<1x128xf32, #tpu.memory_space<vmem>>, vector<1x128xf32>
    %4 = vector.broadcast %3 : vector<1x128xf32> to vector<8x128xf32>
    %5 = arith.addf %2, %4 : vector<8x128xf32>
    %cst_5 = arith.constant dense<0xFF800000> : vector<8xf32>
    %6 = vector.multi_reduction <maximumf>, %5, %cst_5 [1] : vector<8x128xf32> to vector<8xf32>
    %7 = vector.shape_cast %6 : vector<8xf32> to vector<8x1xf32>
    %8 = vector.broadcast %7 : vector<8x1xf32> to vector<8x128xf32>
    %9 = arith.subf %5, %8 : vector<8x128xf32>
    %10 = math.exp %9 : vector<8x128xf32>
    %cst_6 = arith.constant dense<0.000000e+00> : vector<8xf32>
    %11 = vector.multi_reduction <add>, %10, %cst_6 [1] : vector<8x128xf32> to vector<8xf32>
    %12 = vector.shape_cast %11 : vector<8xf32> to vector<8x1xf32>
    %13 = tpu.reciprocal %12 {approx = true} : vector<8x1xf32> -> vector<8x1xf32>
    %14 = vector.broadcast %13 : vector<8x1xf32> to vector<8x128xf32>
    %15 = arith.mulf %10, %14 : vector<8x128xf32>
    %16 = arith.truncf %15 : vector<8x128xf32> to vector<8x128xbf16>
    %c0_7 = arith.constant 0 : index
    %c0_8 = arith.constant 0 : index
    %17 = vector.load %arg4[%c0_7, %c0_8] : memref<128x128xbf16, #tpu.memory_space<vmem>>, vector<128x128xbf16>
    %cst_9 = arith.constant dense<0.000000e+00> : vector<8x128xf32>
    %18 = tpu.matmul %16, %17, %cst_9 {dimension_numbers = #tpu.dot_dimension_numbers<[1], [0], [0], [1], [0, 0, 1, 1], [], []>} : vector<8x128xbf16>, vector<128x128xbf16>, vector<8x128xf32> -> vector<8x128xf32>
    %cst_10 = arith.constant 1.17549435E-38 : f32
    %19 = vector.broadcast %cst_10 : f32 to vector<8x128xf32>
    %20 = arith.addf %18, %19 : vector<8x128xf32>
    %21 = math.log %20 : vector<8x128xf32>
    %c0_11 = arith.constant 0 : index
    %c0_12 = arith.constant 0 : index
    %22 = vector.load %arg5[%c0_11, %c0_12] : memref<8x128xf32, #tpu.memory_space<vmem>>, vector<8x128xf32>
    tpu.vector_store %arg5[%c0_11, %c0_12], %21 {strides = array<i32>} : memref<8x128xf32, #tpu.memory_space<vmem>>, vector<8x128xf32>,
    return
  }
  func.func @transform_0(%arg0: i32) -> (i32, i32) {
    %c0_i32 = arith.constant 0 : i32
    %c0_i32_0 = arith.constant 0 : i32
    return %arg0, %c0_i32 : i32, i32
  }
  func.func @transform_1(%arg0: i32) -> (i32, i32) {
    %c0_i32 = arith.constant 0 : i32
    %c0_i32_0 = arith.constant 0 : i32
    %c0_i32_1 = arith.constant 0 : i32
    return %c0_i32, %c0_i32_0 : i32, i32
  }
  func.func @transform_2(%arg0: i32) -> (i32, i32) {
    %c0_i32 = arith.constant 0 : i32
    %c0_i32_0 = arith.constant 0 : i32
    %c0_i32_1 = arith.constant 0 : i32
    return %c0_i32, %c0_i32_0 : i32, i32
  }
  func.func @transform_3(%arg0: i32) -> (i32, i32) {
    %c0_i32 = arith.constant 0 : i32
    %c0_i32_0 = arith.constant 0 : i32
    %c0_i32_1 = arith.constant 0 : i32
    return %c0_i32, %c0_i32_0 : i32, i32
  }
  func.func @transform_4(%arg0: i32) -> (i32, i32) {
    %c0_i32 = arith.constant 0 : i32
    %c0_i32_0 = arith.constant 0 : i32
    return %arg0, %c0_i32 : i32, i32
  }
}

</mosaic_0001>

<bundles_post_ra>
// kernel: rebin_adapter_forward.1
= control target key start
LH: loop header
LB: loop body
LE: loop exit
PB: predicated region body
PF: predicated region fallthrough
CT: control target
= control target key end

     0   :  { %s313_s0 = inlined_call_operand.vmem [shape: bf16[8,32], index: 0, kind: input, shape index: {}]   ;;  %s314_s1 = inlined_call_operand.vmem [shape: bf16[32,128], index: 1, kind: input, shape index: {}]   ;;  %s315_s2 = inlined_call_operand.vmem [shape: f32[1,128], index: 2, kind: input, shape index: {}]   ;;  %s316_s3 = inlined_call_operand.vmem [shape: bf16[128,128], index: 3, kind: input, shape index: {}]   ;;  %s317_s4 = inlined_call_operand.hbm [shape: f32[8,128], index: 4, kind: output, shape index: {}]  }
   0x1   :  { %v205_v0 = vld [vmem:[%s314_s1 + $0x8] sm:$0xff] }
   0x2   :  { %9 = vsyncpa [#allocation3], 0  ;;  %50 = vmatpush.bf16.msra.mxu0 %v205_v0  ;;  %v204_v1 = vld [vmem:[%s314_s1] sm:$0xff]  ;;  %vm40_vm0 = vcmask 261120   ;;  %v213_v7 = vld [vmem:[%s316_s3 + $0x38] sm:$0xff]  ;;  %s248_s10 = smov [#allocation2]  }
   0x3   :  { %v19_v2 = vld [vmem:[%s313_s0] sm:$0xf]  ;;  %131 = vmatpush.bf16.msra.mxu1 %v213_v7  ;;  %v212_v8 = vld [vmem:[%s316_s3 + $0x30] sm:$0xff]  ;;  %v211_v9 = vld [vmem:[%s316_s3 + $0x28] sm:$0xff]  ;;  %s152_s11 = sshll.u32 %s248_s10, 4  ;;  %s154_s14 = sshll.u32 %s317_s4, 4  ;;  %s153_s11 = int_to_ptr.vmem [resolvable:$true] %s152_s11  ;;  %s155_s14 = int_to_ptr.hbm [resolvable:$true] %s154_s14 }
   0x4   :  { %v215_v3 = vld [vmem:[%s315_s2] ss:$0 sm:$0xff]  ;;  %v209_v11 = vld [vmem:[%s316_s3 + $0x18] sm:$0xff]  ;;  %v208_v16 = vld [vmem:[%s316_s3 + $0x10] sm:$0xff] }
   0x5   :  { %v210_v10 = vld [vmem:[%s316_s3 + $0x20] sm:$0xff]  ;;  %v207_v17 = vld [vmem:[%s316_s3 + $0x8] sm:$0xff] }
   0x6   :  { %51 = vmatpush.bf16.msra.mxu0 %v204_v1  ;;  %v206_v18 = vld [vmem:[%s316_s3] sm:$0xff] }
   0x7   :  { %132 = vmatpush.bf16.msra.mxu1 %v212_v8 }
   0x9   :  { %171 = vmatmul.msk.bf16.vlgmr.msra.gmra.mxu0 %vm40_vm0, %v19_v2 }
   0xb   :  { %133 = vmatpush.bf16.msra.mxu1 %v211_v9 }
   0xf   :  { %134 = vmatpush.bf16.msra.mxu1 %v210_v10 }
  0x13   :  { %135 = vmatpush.bf16.msra.mxu1 %v209_v11 }
  0x17   :  { %136 = vmatpush.bf16.msra.mxu1 %v208_v16 }
  0x1b   :  { %137 = vmatpush.bf16.msra.mxu1 %v207_v17 }
  0x1f   :  { %138 = vmatpush.bf16.msra.mxu1 %v206_v18 }
  0x86   :  { %v53_v4 = vpop.f32.mrf.mxu0 }
  0x87   :  { %v54_v5 = vadd.f32 %v215_v3, %v53_v4 }
  0x89   :  { %57 = vmax.xlane.f32.xlu0 %v54_v5 }
  0x8e   :  { %v55_v6 = vpop.f32.mrf.mxu0 }
  0xfc   :  { %v58_v12 = vpop.xlane.xlu0 %57 }
  0xfd   :  { %v59_v13 = vsub.f32 %v54_v5, %v58_v12 }
  0xff   :  { %v60_v14 = vmul.f32 1.442695, %v59_v13 }
 0x101   :  { %216 = vpow2.f32 %v60_v14 }
 0x107   :  { %v217_v15 = vpop.eup %216 }
 0x108   :  { %62 = vadd.xlane.f32.xlu0 %v217_v15 }
 0x17b   :  { %v63_v19 = vpop.xlane.xlu0 %62 }
 0x17c   :  { %218 = vrcp.f32 %v63_v19 }
 0x182   :  { %v219_v20 = vpop.eup %218 }
 0x183   :  { %v65_v21 = vmul.f32 %v219_v20, %v217_v15 }
 0x185   :  { %v66_v22 = vpack.c.bf16 %v65_v21, %v65_v21 }
 0x187   :  { %139 = vmatmul.bf16.vlgmr.msra.gmra.mxu1 %v66_v22 }
 0x204   :  { %v140_v23 = vpop.f32.mrf.mxu1 }
 0x205   :  { %v141_v24 = vadd.f32 1.1754944e-38, %v140_v23 }
 0x207   :  { %220 = vlog2.f32 %v141_v24 }
 0x20c   :  { %v142_v25 = vpop.f32.mrf.mxu1 }
 0x20d   :  { %v221_v26 = vpop.eup %220 }
 0x20e   :  { %v145_v27 = vmul.f32 0.6931472, %v221_v26 }
 0x210   :  { %146 = vst [vmem:[#allocation2] sm:$0xff] %v145_v27 }
 0x211   :  { %157 = dma.vmem_to_hbm [thread:$0]  %s153_s11, 128, %s155_s14, [#allocation3]  }
 0x212   :  { %246 = dma.done.wait [#allocation3], 128  }
 0x213   :  { %247 = vsyncadd [#allocation3], 4294967168 }
 0x214   :  { %162 = vsyncpa [#allocation3], 1 }

</bundles_post_ra>
